<compile_context>
chip_gen: v7x
topology: tpu7x:2x2x1
jax: 0.10.0
libtpu: 0.0.40
codegen_flags: <defaults>
</compile_context>

<pallas_src>
import jax
import jax.numpy as jnp
from jax import lax
from jax.experimental import pallas as pl
from jax.experimental.pallas import tpu as pltpu

F32 = jnp.float32


def _loc_kernel(x_ref, out_ref):
    """One (batch, channel-tile) block: x (1,TC,H,W) -> out (1,2,TC,H,W)."""
    x = x_ref[0].astype(F32)                     # (TC, H, W)
    shp = x.shape
    H, W = shp[1], shp[2]

    # Border masks implementing F.conv2d(..., padding=1) zero padding.
    row = lax.broadcasted_iota(jnp.int32, shp, 1)
    col = lax.broadcasted_iota(jnp.int32, shp, 2)
    top, bot = row == 0, row == H - 1
    left, right = col == 0, col == W - 1

    # Shifted neighbours, each built once and reused by all filters.
    # pltpu.roll follows jnp.roll semantics: out[..., i] = x[..., i - shift].
    xm1 = jnp.where(top, 0.0, pltpu.roll(x, 1, 1))        # x[i-1, j]
    xp1 = jnp.where(bot, 0.0, pltpu.roll(x, H - 1, 1))    # x[i+1, j]
    xl = jnp.where(left, 0.0, pltpu.roll(x, 1, 2))        # x[i, j-1]
    xr = jnp.where(right, 0.0, pltpu.roll(x, W - 1, 2))   # x[i, j+1]

    dii = xm1 + xp1 - 2.0 * x
    djj = xl + xr - 2.0 * x
    di = 0.5 * (xp1 - xm1)
    dj = 0.5 * (xr - xl)

    t = xm1 - xp1                                         # x[i-1,j] - x[i+1,j]
    tl = jnp.where(left, 0.0, pltpu.roll(t, 1, 2))        # x[i-1,j-1]-x[i+1,j-1]
    tr = jnp.where(right, 0.0, pltpu.roll(t, W - 1, 2))   # x[i-1,j+1]-x[i+1,j+1]
    dij = 0.25 * (tl - tr)

    det = dii * djj - dij * dij
    inv_det = 1.0 / det           # exact divide keeps torch's det==0 inf/nan path
    inv00 = djj * inv_det
    inv01 = -dij * inv_det
    inv11 = dii * inv_det

    step_i = -(inv00 * di + inv01 * dj)
    step_j = -(inv01 * di + inv11 * dj)

    # torch: loc[isnan(loc)] = 0.0   (only NaN masked; +/-inf passes through)
    step_i = jnp.where(jnp.isnan(step_i), 0.0, step_i)
    step_j = jnp.where(jnp.isnan(step_j), 0.0, step_j)

    out_ref[0, 0] = step_i
    out_ref[0, 1] = step_j


_TARGET_BLOCK_BYTES = 512 * 1024      # ~0.5 MiB per f32 input block


def _pick_channel_tile(C, H, W):
    """Largest channel tile (divisor of C) whose f32 block stays ~0.5 MiB."""
    # TODO(synk): add spatial (H) tiling with a 1-row halo for feature maps
    # where a single channel plane exceeds the target; typical D2Net feature
    # maps (<= ~200x200) never need it.
    plane_bytes = H * W * 4
    tc = 1
    for cand in range(1, C + 1):
        if C % cand == 0 and cand * plane_bytes <= _TARGET_BLOCK_BYTES:
            tc = cand
    return tc


def handcrafted_localization(x):
    """HandcraftedLocalizationModule forward: (B, C, H, W) -> (B, 2, C, H, W)."""
    B, C, H, W = x.shape
    TC = _pick_channel_tile(C, H, W)
    n_ct = C // TC

    block_bytes = TC * H * W * 4
    # ~18 live block-sized buffers per step (2 in, 4 out, ~12 temporaries).
    vmem_limit = int(min(max(32 * 1024 * 1024, 24 * block_bytes),
                         64 * 1024 * 1024))

    return pl.pallas_call(
        _loc_kernel,
        out_shape=jax.ShapeDtypeStruct((B, 2, C, H, W), F32),
        grid=(B, n_ct),
        in_specs=[pl.BlockSpec((1, TC, H, W), lambda b, c: (b, c, 0, 0))],
        out_specs=pl.BlockSpec((1, 2, TC, H, W), lambda b, c: (b, 0, c, 0, 0)),
        compiler_params=pltpu.CompilerParams(
            dimension_semantics=("parallel", "parallel"),
            vmem_limit_bytes=vmem_limit),
    )(x)


# ----------------------------------------------------------------------------
# Pure-JAX reference (mirrors the torch module) for the self-check.
# ----------------------------------------------------------------------------
def _reference(x):
    B, C, H, W = x.shape
    xp = jnp.pad(x, ((0, 0), (0, 0), (1, 1), (1, 1)))

    def sh(a, b):
        return xp[:, :, 1 + a:1 + a + H, 1 + b:1 + b + W]

    dii = sh(-1, 0) - 2.0 * x + sh(1, 0)
    djj = sh(0, -1) - 2.0 * x + sh(0, 1)
    dij = 0.25 * (sh(-1, -1) - sh(-1, 1) - sh(1, -1) + sh(1, 1))
    di = 0.5 * (sh(1, 0) - sh(-1, 0))
    dj = 0.5 * (sh(0, 1) - sh(0, -1))

    det = dii * djj - dij * dij
    step_i = -((djj / det) * di + (-dij / det) * dj)
    step_j = -((-dij / det) * di + (dii / det) * dj)
    loc = jnp.stack([step_i, step_j], axis=1)
    return jnp.where(jnp.isnan(loc), 0.0, loc), det


if __name__ == "__main__":
    key = jax.random.PRNGKey(0)
    x = jax.random.normal(key, (2, 4, 16, 16), F32)          # (B, C, H, W)

    loc = jax.jit(handcrafted_localization)(x)
    loc = jax.block_until_ready(loc)
    assert loc.shape == (2, 2, 4, 16, 16)

    ref, det = _reference(x)
    # Compare only where the Hessian is well-conditioned; near det==0 the
    # 1/det amplification makes ulp-level rounding differences unbounded in
    # both implementations (same as the torch reference).
    ok = jnp.abs(det)[:, None] > 1e-2                         # (B, 1, C, H, W)
    err = jnp.where(ok, jnp.abs(loc - ref) / jnp.maximum(jnp.abs(ref), 1.0), 0.0)
    max_err = float(jnp.max(err))
    assert max_err < 1e-3, max_err

    print("KERNEL_OK")
</pallas_src>

<mosaic_0001>
module attributes {stable_mosaic.version = 11 : i64} {
  func.func @_loc_kernel(%arg0: i32, %arg1: i32, %arg2: memref<1x4x16x16xf32, #tpu.memory_space<vmem>>, %arg3: memref<1x2x4x16x16xf32, #tpu.memory_space<vmem>>) attributes {dimension_semantics = [#tpu.dimension_semantics<parallel>, #tpu.dimension_semantics<parallel>], iteration_bounds = array<i64: 2, 1>, scalar_prefetch = 0 : i64, scratch_operands = 0 : i64, tpu.core_type = #tpu.core_type<tc>, window_params = [{transform_indices = @transform_0, window_bounds = array<i64: 1, 4, 16, 16>}, {transform_indices = @transform_1, window_bounds = array<i64: 1, 2, 4, 16, 16>}]} {
    %c0 = arith.constant 0 : index
    %c0_0 = arith.constant 0 : index
    %c0_1 = arith.constant 0 : index
    %c0_2 = arith.constant 0 : index
    %0 = vector.load %arg2[%c0, %c0_0, %c0_1, %c0_2] : memref<1x4x16x16xf32, #tpu.memory_space<vmem>>, vector<1x4x16x16xf32>
    %1 = vector.shape_cast %0 : vector<1x4x16x16xf32> to vector<4x16x16xf32>
    %2 = tpu.iota {dimensions = array<i32: 1>} : vector<4x16x16xi32>
    %3 = tpu.iota {dimensions = array<i32: 2>} : vector<4x16x16xi32>
    %c0_i32 = arith.constant 0 : i32
    %4 = vector.broadcast %c0_i32 : i32 to vector<4x16x16xi32>
    %5 = arith.cmpi eq, %2, %4 : vector<4x16x16xi32>
    %c15_i32 = arith.constant 15 : i32
    %6 = vector.broadcast %c15_i32 : i32 to vector<4x16x16xi32>
    %7 = arith.cmpi eq, %2, %6 : vector<4x16x16xi32>
    %c0_i32_3 = arith.constant 0 : i32
    %8 = vector.broadcast %c0_i32_3 : i32 to vector<4x16x16xi32>
    %9 = arith.cmpi eq, %3, %8 : vector<4x16x16xi32>
    %c15_i32_4 = arith.constant 15 : i32
    %10 = vector.broadcast %c15_i32_4 : i32 to vector<4x16x16xi32>
    %11 = arith.cmpi eq, %3, %10 : vector<4x16x16xi32>
    %c1_i32 = arith.constant 1 : i32
    %12 = tpu.dynamic_rotate %1 by %c1_i32 dim 1 : vector<4x16x16xf32>, i32 -> vector<4x16x16xf32>
    %cst = arith.constant 0.000000e+00 : f32
    %13 = vector.broadcast %cst : f32 to vector<4x16x16xf32>
    %14 = arith.select %5, %13, %12 : vector<4x16x16xi1>, vector<4x16x16xf32>
    %c15_i32_5 = arith.constant 15 : i32
    %15 = tpu.dynamic_rotate %1 by %c15_i32_5 dim 1 : vector<4x16x16xf32>, i32 -> vector<4x16x16xf32>
    %cst_6 = arith.constant 0.000000e+00 : f32
    %16 = vector.broadcast %cst_6 : f32 to vector<4x16x16xf32>
    %17 = arith.select %7, %16, %15 : vector<4x16x16xi1>, vector<4x16x16xf32>
    %c1_i32_7 = arith.constant 1 : i32
    %18 = tpu.dynamic_rotate %1 by %c1_i32_7 dim 2 : vector<4x16x16xf32>, i32 -> vector<4x16x16xf32>
    %cst_8 = arith.constant 0.000000e+00 : f32
    %19 = vector.broadcast %cst_8 : f32 to vector<4x16x16xf32>
    %20 = arith.select %9, %19, %18 : vector<4x16x16xi1>, vector<4x16x16xf32>
    %c15_i32_9 = arith.constant 15 : i32
    %21 = tpu.dynamic_rotate %1 by %c15_i32_9 dim 2 : vector<4x16x16xf32>, i32 -> vector<4x16x16xf32>
    %cst_10 = arith.constant 0.000000e+00 : f32
    %22 = vector.broadcast %cst_10 : f32 to vector<4x16x16xf32>
    %23 = arith.select %11, %22, %21 : vector<4x16x16xi1>, vector<4x16x16xf32>
    %24 = arith.addf %14, %17 : vector<4x16x16xf32>
    %cst_11 = arith.constant 2.000000e+00 : f32
    %25 = vector.broadcast %cst_11 : f32 to vector<4x16x16xf32>
    %26 = arith.mulf %25, %1 : vector<4x16x16xf32>
    %27 = arith.subf %24, %26 : vector<4x16x16xf32>
    %28 = arith.addf %20, %23 : vector<4x16x16xf32>
    %cst_12 = arith.constant 2.000000e+00 : f32
    %29 = vector.broadcast %cst_12 : f32 to vector<4x16x16xf32>
    %30 = arith.mulf %29, %1 : vector<4x16x16xf32>
    %31 = arith.subf %28, %30 : vector<4x16x16xf32>
    %32 = arith.subf %17, %14 : vector<4x16x16xf32>
    %cst_13 = arith.constant 5.000000e-01 : f32
    %33 = vector.broadcast %cst_13 : f32 to vector<4x16x16xf32>
    %34 = arith.mulf %33, %32 : vector<4x16x16xf32>
    %35 = arith.subf %23, %20 : vector<4x16x16xf32>
    %cst_14 = arith.constant 5.000000e-01 : f32
    %36 = vector.broadcast %cst_14 : f32 to vector<4x16x16xf32>
    %37 = arith.mulf %36, %35 : vector<4x16x16xf32>
    %38 = arith.subf %14, %17 : vector<4x16x16xf32>
    %c1_i32_15 = arith.constant 1 : i32
    %39 = tpu.dynamic_rotate %38 by %c1_i32_15 dim 2 : vector<4x16x16xf32>, i32 -> vector<4x16x16xf32>
    %cst_16 = arith.constant 0.000000e+00 : f32
    %40 = vector.broadcast %cst_16 : f32 to vector<4x16x16xf32>
    %41 = arith.select %9, %40, %39 : vector<4x16x16xi1>, vector<4x16x16xf32>
    %c15_i32_17 = arith.constant 15 : i32
    %42 = tpu.dynamic_rotate %38 by %c15_i32_17 dim 2 : vector<4x16x16xf32>, i32 -> vector<4x16x16xf32>
    %cst_18 = arith.constant 0.000000e+00 : f32
    %43 = vector.broadcast %cst_18 : f32 to vector<4x16x16xf32>
    %44 = arith.select %11, %43, %42 : vector<4x16x16xi1>, vector<4x16x16xf32>
    %45 = arith.subf %41, %44 : vector<4x16x16xf32>
    %cst_19 = arith.constant 2.500000e-01 : f32
    %46 = vector.broadcast %cst_19 : f32 to vector<4x16x16xf32>
    %47 = arith.mulf %46, %45 : vector<4x16x16xf32>
    %48 = arith.mulf %27, %31 : vector<4x16x16xf32>
    %49 = arith.mulf %47, %47 : vector<4x16x16xf32>
    %50 = arith.subf %48, %49 : vector<4x16x16xf32>
    %cst_20 = arith.constant 1.000000e+00 : f32
    %51 = vector.broadcast %cst_20 : f32 to vector<4x16x16xf32>
    %52 = arith.divf %51, %50 : vector<4x16x16xf32>
    %53 = arith.mulf %31, %52 : vector<4x16x16xf32>
    %cst_21 = arith.constant 0.000000e+00 : f32
    %54 = vector.broadcast %cst_21 : f32 to vector<4x16x16xf32>
    %55 = arith.subf %54, %47 : vector<4x16x16xf32>
    %56 = arith.mulf %55, %52 : vector<4x16x16xf32>
    %57 = arith.mulf %27, %52 : vector<4x16x16xf32>
    %58 = arith.mulf %53, %34 : vector<4x16x16xf32>
    %59 = arith.mulf %56, %37 : vector<4x16x16xf32>
    %60 = arith.addf %58, %59 : vector<4x16x16xf32>
    %cst_22 = arith.constant 0.000000e+00 : f32
    %61 = vector.broadcast %cst_22 : f32 to vector<4x16x16xf32>
    %62 = arith.subf %61, %60 : vector<4x16x16xf32>
    %63 = arith.mulf %56, %34 : vector<4x16x16xf32>
    %64 = arith.mulf %57, %37 : vector<4x16x16xf32>
    %65 = arith.addf %63, %64 : vector<4x16x16xf32>
    %cst_23 = arith.constant 0.000000e+00 : f32
    %66 = vector.broadcast %cst_23 : f32 to vector<4x16x16xf32>
    %67 = arith.subf %66, %65 : vector<4x16x16xf32>
    %68 = arith.cmpf one, %62, %62 : vector<4x16x16xf32>
    %cst_24 = arith.constant 0.000000e+00 : f32
    %69 = vector.broadcast %cst_24 : f32 to vector<4x16x16xf32>
    %70 = arith.select %68, %69, %62 : vector<4x16x16xi1>, vector<4x16x16xf32>
    %71 = arith.cmpf one, %67, %67 : vector<4x16x16xf32>
    %cst_25 = arith.constant 0.000000e+00 : f32
    %72 = vector.broadcast %cst_25 : f32 to vector<4x16x16xf32>
    %73 = arith.select %71, %72, %67 : vector<4x16x16xi1>, vector<4x16x16xf32>
    %c0_26 = arith.constant 0 : index
    %c0_27 = arith.constant 0 : index
    %c0_28 = arith.constant 0 : index
    %c0_29 = arith.constant 0 : index
    %c0_30 = arith.constant 0 : index
    %74 = vector.load %arg3[%c0_26, %c0_27, %c0_28, %c0_29, %c0_30] : memref<1x2x4x16x16xf32, #tpu.memory_space<vmem>>, vector<1x1x4x16x16xf32>
    %75 = vector.shape_cast %74 : vector<1x1x4x16x16xf32> to vector<4x16x16xf32>
    %76 = vector.shape_cast %70 : vector<4x16x16xf32> to vector<1x1x4x16x16xf32>
    tpu.vector_store %arg3[%c0_26, %c0_27, %c0_28, %c0_29, %c0_30], %76 {strides = array<i32>} : memref<1x2x4x16x16xf32, #tpu.memory_space<vmem>>, vector<1x1x4x16x16xf32>,
    %c0_31 = arith.constant 0 : index
    %c1 = arith.constant 1 : index
    %c0_32 = arith.constant 0 : index
    %c0_33 = arith.constant 0 : index
    %c0_34 = arith.constant 0 : index
    %77 = vector.load %arg3[%c0_31, %c1, %c0_32, %c0_33, %c0_34] : memref<1x2x4x16x16xf32, #tpu.memory_space<vmem>>, vector<1x1x4x16x16xf32>
    %78 = vector.shape_cast %77 : vector<1x1x4x16x16xf32> to vector<4x16x16xf32>
    %79 = vector.shape_cast %73 : vector<4x16x16xf32> to vector<1x1x4x16x16xf32>
    tpu.vector_store %arg3[%c0_31, %c1, %c0_32, %c0_33, %c0_34], %79 {strides = array<i32>} : memref<1x2x4x16x16xf32, #tpu.memory_space<vmem>>, vector<1x1x4x16x16xf32>,
    return
  }
  func.func @transform_0(%arg0: i32, %arg1: i32) -> (i32, i32, i32, i32) {
    %c0_i32 = arith.constant 0 : i32
    %c0_i32_0 = arith.constant 0 : i32
    %c0_i32_1 = arith.constant 0 : i32
    return %arg0, %arg1, %c0_i32, %c0_i32_0 : i32, i32, i32, i32
  }
  func.func @transform_1(%arg0: i32, %arg1: i32) -> (i32, i32, i32, i32, i32) {
    %c0_i32 = arith.constant 0 : i32
    %c0_i32_0 = arith.constant 0 : i32
    %c0_i32_1 = arith.constant 0 : i32
    %c0_i32_2 = arith.constant 0 : i32
    return %arg0, %c0_i32, %arg1, %c0_i32_0, %c0_i32_1 : i32, i32, i32, i32, i32
  }
}

</mosaic_0001>

<bundles_post_ra>
// kernel: handcrafted_localization.1
= control target key start
LH: loop header
LB: loop body
LE: loop exit
PB: predicated region body
PF: predicated region fallthrough
CT: control target
= control target key end

     0   :  { %6 = vsyncpa [#allocation3], 0  ;;  %s2034_s0 = inlined_call_operand.hbm [shape: f32[2,4,16,16], index: 0, kind: input, shape index: {}]   ;;  %s2035_s1 = inlined_call_operand.hbm [shape: f32[2,2,4,16,16], index: 1, kind: output, shape index: {}]  }
   0x1   :  { %8 = vsyncpa [#allocation3 + $0x1], 0 }
   0x2   :  { %9 = vsyncpa [#allocation4], 0 }
   0x3   :  { %11 = vsyncpa [#allocation4 + $0x1], 0  ;;  %s1095_s6 = smov 0   ;;  %s1097_s7 = smov 0  }
   0x4   :  { %s1099_s8 = smov 0   ;;  %s1101_s9 = smov 0  }
   0x5   :  { %s1103_s10 = smov 0   ;;  %s1105_s11 = smov 0  }
   0x6 LB: > { %s852_s12 = sadd.s32 4294967295, %s1074_s11   ;;  %s853_s13 = sadd.s32 4294967294, %s1074_s11   ;;  %s1074_s11 = sphi %s1105_s11, %s17_s11   ;;  %s1070_s10 = sphi %s1103_s10, %s2091_s10   ;;  %s1066_s9 = sphi %s1101_s9, %s2090_s9   ;;  %s1062_s8 = sphi %s1099_s8, %s2089_s8   ;;  %s1058_s7 = sphi %s1097_s7, %s2088_s7   ;;  %s1054_s6 = sphi %s1095_s6, %s2087_s6  }
   0x7   : > { %s29_s14 = sadd.s32 1, %s1070_s10  ;;  %s38_s15 = sadd.s32 1, %s1062_s8 }
   0x8   : > { %p31_p0 = scmp.ge.s32.totalorder %s29_s14, 2  ;;  %p45_p1 = scmp.ne.s32.totalorder %s1062_s8, %s1058_s7 }
   0x9   : > { %p46_p2 = scmp.eq.s32.totalorder %s1074_s11, 0  ;;  %p51_p3 = scmp.ne.s32.totalorder %s1058_s7, %s1054_s6 }
   0xa   : > { %s2093_s14 = smov (%p31_p0, %s29_s14), 0  ;;  %p52_p5 = scmp.eq.s32.totalorder %s852_s12, 0 }
   0xb   : > { %p1136_p4 = por %p46_p2, %p45_p1  ;;  %s33_s17 = ssub.s32 %s1070_s10, %s2093_s14 }
   0xc   : > { %p77_p6 = scmp.eq.s32.totalorder %s852_s12, 1  ;;  %p36_p7 = scmp.eq.s32.totalorder %s33_s17, 0 }
   0xd   : > { %p1142_p8 = por %p52_p5, %p51_p3  ;;  %p83_p10 = scmp.eq.s32.totalorder %s853_s13, 1 }
   0xe   : > { %p1146_p9 = por %p77_p6, %p45_p1  ;;  %p889_p13 = scmp.lt.s32.totalorder %s1074_s11, 2 }
   0xf   : > { %s1151_s20 = scalar_select %p36_p7, %s1062_s8, %s38_s15  }
  0x10   : > { %s2049_s19 = scalar_select %p1146_p9, 1, 0 }
  0x11   : > { %p1153_p11 = por %p83_p10, %p51_p3  ;;  %s103_s22 = sand.u32 1, %s1062_s8  }
  0x12   : > { %s856_s23 = sshll.u32 %s103_s22, 6  ;;  %s875_s24 = sshll.u32 %s1070_s10, 10 }
  0x13   : > { %s2050_s21 = scalar_select %p1153_p11, 1, 0 }
  0x14   : > { %s1164_s27 = scalar_lea.hbm %s2034_s0, %s875_s24  ;;  %s107_s28 = scalar_lea.vmem [#allocation2], %s856_s23 }
  0x15   : > { %s117_s29 = sshll.u32 %s107_s28, 4  ;;  %p1170_p0 = pnand %p889_p13, %p1136_p4  ;;  %s1166_s29 = int_to_ptr.vmem [resolvable:$true] %s117_s29 }
  0x16   : > { %s1175_s2 = scalar_lea.sflag [#allocation3], %s103_s22  ;;  %s962_s3 = scalar_lea.hbm %s1164_s27, 1024 }
  0x17   : > { %p963_p2 = scmp.ne.s32.totalorder %s1164_s27, %s962_s3  ;;  %p964_p3 = pneg %p1170_p0 }
  0x18   : > { %s967_s12 = scalar_lea.hbm %s2034_s0, 2048  ;;  %p968_p4 = scmp.lt.u32.totalorder %s1164_s27, %s2034_s0 }
  0x19   : > { %p965_p5 = pnand %p964_p3, %p963_p2  ;;  %p969_p7 = scmp.lt.u32.totalorder %s967_s12, %s962_s3 }
  0x1a   : > { %p971_p13 = scmp.lt.u32.totalorder %s962_s3, %s1164_s27 }
  0x1b   : > { %p966_p6 = pneg %p965_p5  ;;  %p970_p10 = por %p969_p7, %p968_p4 }
  0x1d   : > { %p972_p12 = por %p971_p13, %p970_p10 }
  0x1f   : > { %p973_p1 = pnand %p972_p12, %p966_p6 }
  0x21   : > { %976 = shalt.err (!%p973_p1)
}
  0x22   : > { %s977_s16 = scalar_lea.vmem %s1166_s29, 1024  ;;  %s1076_s17 = smov [#allocation2]  }
  0x23   : > { %p978_p2 = scmp.ne.s32.totalorder %s1166_s29, %s977_s16  ;;  %s982_s22 = sshll.u32 %s1076_s17, 4  ;;  %s983_s22 = int_to_ptr.vmem [resolvable:$false] %s982_s22 }
  0x24   : > { %s984_s23 = scalar_lea.vmem %s983_s22, 2048  ;;  %p985_p9 = scmp.lt.s32.totalorder %s1166_s29, %s983_s22 }
  0x25   : > { %p980_p5 = pnand %p978_p2, %p964_p3  ;;  %p986_p4 = scmp.lt.s32.totalorder %s984_s23, %s977_s16 }
  0x27   : > { %p981_p11 = pneg %p980_p5  ;;  %p987_p7 = por %p986_p4, %p985_p9 }
  0x29   : > { %p988_p10 = pnand %p987_p7, %p981_p11 }
  0x2b   : > { %991 = shalt.err (!%p988_p10)
}
  0x2c   : > { %s1077_s24 = smov 128   ;;  %s1078_s25 = smov 8  }
  0x2d   : > { %884 = dma.hbm_to_vmem [thread:$0]  (!%p1170_p0), %s1164_s27, 1024, %s1166_s29, %s1175_s2, %s1077_s24, %s1077_s24, %s1078_s25  }
  0x2e   : > { %p125_p12 = scmp.lt.s32.totalorder %s1074_s11, 3  ;;  %p2052_p1 = scmp.ge.s32.totalorder %s1074_s11, 1 }
  0x30   : > { %p126_p3 = pnand %p2052_p1, %p125_p12 }
  0x32   : > { %129 = sbr.rel (%p126_p3) target bundleno = 541 (0x21d), region = 24 }
  0x39   : > { %s1207_s26 = sand.u32 1, %s1058_s7  }
  0x3a   : > { %s860_s28 = sshll.u32 %s1207_s26, 6  ;;  %s132_s3 = scalar_lea.sflag [#allocation3], %s1207_s26 }
  0x3b   : > { %s1211_s4 = scalar_lea.vmem [#allocation2], %s860_s28 }
  0x3c   : > { %1045 = dma.done.wait (%p1142_p8), %s132_s3, 1024  }
  0x3d   : > { %1047 = vsyncadd (%p1142_p8), %s132_s3, 4294966272  ;;  %v164_v0 = vlaneseq  ;;  %v1224_v3 = vld [vmem:[%s1211_s4] sm:$0xff]  ;;  %v1227_v4 = vld [vmem:[%s1211_s4 + $0x10] sm:$0xff]  ;;  %s1079_s18 = smov 16   ;;  %vm225_vm4 = vcmask 1047680   ;;  %s1080_s27 = smov 113  }
  0x3e   : > { %v1230_v5 = vld [vmem:[%s1211_s4 + $0x8] sm:$0xff]  ;;  %226 = vrot.lane.b32.xlu0 %v1224_v3, %s1079_s18  ;;  %232 = vrot.lane.b32.xlu1 %v1227_v4, %s1079_s18  ;;  %v1240_v6 = vld [vmem:[%s1211_s4 + $0x18] sm:$0xff]  ;;  %v175_v7 = vrot.slane %v1224_v3, 7  ;;  %v200_v9 = vrot.slane %v1224_v3, 1  ;;  %v176_v11 = vrot.slane %v1227_v4, 7  ;;  %v201_v13 = vrot.slane %v1227_v4, 1 }
  0x3f   : > { %v1218_v1 = vshrl.u32 %v164_v0, 7  ;;  %v179_v8 = vrot.slane %v1230_v5, 7  ;;  %v204_v10 = vrot.slane %v1230_v5, 1  ;;  %v180_v12 = vrot.slane %v1240_v6, 7  ;;  %v1250_v14 = vld [vmem:[%s1211_s4 + $0x20] sm:$0xff]  ;;  %v1274_v22 = vld [vmem:[%s1211_s4 + $0x28] sm:$0xff] }
  0x40   : > { %v205_v17 = vrot.slane %v1240_v6, 1  ;;  %v177_v21 = vrot.slane %v1250_v14, 7  ;;  %v181_v28 = vrot.slane %v1274_v22, 7  ;;  %v202_v32 = vrot.slane %v1250_v14, 1  ;;  %v1319_v36 = vld [vmem:[%s1211_s4 + $0x30] sm:$0xff]  ;;  %v1322_v37 = vld [vmem:[%s1211_s4 + $0x38] sm:$0xff] }
  0x41   : > { %v1221_v2 = vadd.s32 8, %v1218_v1  ;;  %vm169_vm0 = vcmp.eq.s32.totalorder %v1218_v1, 0  ;;  %vm183_vm1 = vcmp.lt.s32.totalorder %v1218_v1, 1  ;;  %vm208_vm2 = vcmp.lt.s32.totalorder %v1218_v1, 7  ;;  %s1081_s29 = smov 127   ;;  %s861_s30 = sshll.u32 %s1207_s26, 7 }
  0x42   : > { %v188_v15 = vsel %vm183_vm1, %v179_v8, %v175_v7  ;;  %v1256_v16 = vsel %vm208_vm2, %v200_v9, %v204_v10  ;;  %v189_v19 = vsel %vm183_vm1, %v180_v12, %v176_v11  ;;  %v213_v20 = vsel %vm208_vm2, %v204_v10, %v200_v9  ;;  %229 = vrot.lane.b32.xlu0 %v1230_v5, %s1079_s18  ;;  %s1902_s2 = scalar_lea.vmem [#allocation5], %s861_s30  ;;  %s876_s5 = sshll.u32 %s1066_s9, 11 }
  0x43   : > { %vm172_vm3 = vcmp.eq.s32.totalorder %v1221_v2, 15  ;;  %v1262_v18 = vsel %vm169_vm0, 0.0, %v188_v15  ;;  %235 = vrot.lane.b32.xlu1 %v1240_v6, %s1079_s18  ;;  %v1284_v25 = vsel %vm169_vm0, 0.0, %v189_v19  ;;  %v1288_v26 = vsel %vm208_vm2, %v201_v13, %v205_v17  ;;  %s765_s12 = sshll.u32 %s1902_s2, 4  ;;  %s1979_s16 = scalar_lea.hbm %s2035_s1, %s876_s5  ;;  %s1981_s12 = int_to_ptr.vmem [resolvable:$true] %s765_s12 }
  0x44   : > { %v1278_v23 = vadd.f32 %v1256_v16, %v1262_v18  ;;  %v1292_v27 = vsel %vm183_vm1, %v175_v7, %v179_v8  ;;  %v1297_v29 = vadd.f32 %v1288_v26, %v1284_v25  ;;  %v1303_v31 = vsel %vm172_vm3, 0.0, %v213_v20  ;;  %s749_s9 = scalar_lea.sflag [#allocation4], %s1207_s26  ;;  %s992_s17 = scalar_lea.vmem %s1981_s12, 2048 }
  0x45   : > { %v1308_v33 = vadd.f32 %v1303_v31, %v1292_v27  ;;  %v190_v35 = vsel %vm183_vm1, %v181_v28, %v177_v21  ;;  %v206_v39 = vrot.slane %v1274_v22, 1  ;;  %v1331_v40 = vsel %vm183_vm1, %v176_v11, %v180_v12  ;;  %p993_p8 = scmp.ne.s32.totalorder %s1981_s12, %s992_s17  ;;  %p2084_p9 = scmp.ne.s32.totalorder %s2049_s19, 0 }
  0x46   : > { %238 = vrot.lane.b32.xlu0 %v1250_v14, %s1079_s18  ;;  %v1326_v38 = vsel %vm169_vm0, 0.0, %v190_v35  ;;  %v214_v41 = vsel %vm208_vm2, %v205_v17, %v201_v13  ;;  %v178_v42 = vrot.slane %v1319_v36, 7  ;;  %v182_v43 = vrot.slane %v1322_v37, 7  ;;  %s1082_s22 = smov [#allocation5]  }
  0x47   : > { %241 = vrot.lane.b32.xlu1 %v1274_v22, %s1079_s18  ;;  %v1339_v44 = vsel %vm208_vm2, %v202_v32, %v206_v39  ;;  %v1343_v45 = vsel %vm172_vm3, 0.0, %v214_v41  ;;  %v203_v46 = vrot.slane %v1319_v36, 1  ;;  %v207_v47 = vrot.slane %v1322_v37, 1  ;;  %p994_p11 = pnand %p993_p8, %p2084_p9  ;;  %s996_s23 = sshll.u32 %s1082_s22, 4  ;;  %s997_s23 = int_to_ptr.vmem [resolvable:$false] %s996_s23 }
  0x48   : > { %v1349_v48 = vsub.f32 %v1262_v18, %v1256_v16  ;;  %v1353_v49 = vadd.f32 %v1339_v44, %v1326_v38  ;;  %v1359_v51 = vadd.f32 %v1343_v45, %v1331_v40  ;;  %v1367_v52 = vsub.f32 %v1292_v27, %v1303_v31  ;;  %s998_s24 = scalar_lea.vmem %s997_s23, 4096  ;;  %p999_p6 = scmp.lt.s32.totalorder %s1981_s12, %s997_s23 }
  0x49   : > { %v191_v54 = vsel %vm183_vm1, %v182_v43, %v178_v42  ;;  %v1379_v56 = vsel %vm208_vm2, %v203_v46, %v207_v47  ;;  %v1389_v59 = vsub.f32 %v1284_v25, %v1288_v26  ;;  %v1393_v60 = vsub.f32 %v1331_v40, %v1343_v45  ;;  %p995_p0 = pneg %p994_p11  ;;  %p1000_p13 = scmp.lt.s32.totalorder %s998_s24, %s992_s17 }
  0x4a   : > { %244 = vrot.lane.b32.xlu0 %v1319_v36, %s1079_s18  ;;  %v1375_v55 = vsel %vm169_vm0, 0.0, %v191_v54  ;;  %v215_v61 = vsel %vm208_vm2, %v206_v39, %v202_v32  ;;  %v216_v62 = vsel %vm208_vm2, %v207_v47, %v203_v46  ;;  %v1405_v63 = vsel %vm183_vm1, %v177_v21, %v181_v28 }
  0x4b   : > { %247 = vrot.lane.b32.xlu1 %v1322_v37, %s1079_s18  ;;  %v1383_v57 = vadd.f32 %v1379_v56, %v1375_v55  ;;  %v1409_v7 = vsel %vm172_vm3, 0.0, %v215_v61  ;;  %v1413_v8 = vsel %vm183_vm1, %v178_v42, %v182_v43  ;;  %v1417_v9 = vsel %vm172_vm3, 0.0, %v216_v62  ;;  %p1001_p2 = por %p1000_p13, %p999_p6 }
  0x4c   : > { %2053 = vst [vmem:[#allocation8_spill] sm:$0xff] %v1413_v8  ;;  %2054 = vst [vmem:[#allocation9_spill] sm:$0xff] %v1417_v9  ;;  %v1421_v10 = vadd.f32 %v1409_v7, %v1405_v63  ;;  %v1427_v12 = vadd.f32 %v1417_v9, %v1413_v8  ;;  %v1435_v2 = vsub.f32 %v1326_v38, %v1339_v44  ;;  %v361_v11 = vmul.f32 2.0, %v1322_v37 }
  0x4d   : > { %v1441_v13 = vsub.f32 %v1405_v63, %v1409_v7  ;;  %v1447_v15 = vsub.f32 %v1375_v55, %v1379_v56  ;;  %v1453_v17 = vsub.f32 %v1413_v8, %v1417_v9  ;;  %vm730_vm7 = vcmask 130048   ;;  %p1002_p5 = pnand %p1001_p2, %p995_p0 }
  0x4e   : > { %426 = vrot.lane.b32.xlu0 %v1349_v48, %s1079_s18  ;;  %v1714_v50 = vsub.f32 %v1427_v12, %v361_v11 }
  0x4f   : > { %429 = vrot.lane.b32.xlu1 %v1367_v52, %s1079_s18 }
  0x50   : > { %2060 = vst [vmem:[#allocation15_spill] sm:$0xff] %v1714_v50 }
  0x52   : > { %432 = vrot.lane.b32.xlu0 %v1389_v59, %s1079_s18 }
  0x53   : > { %435 = vrot.lane.b32.xlu1 %v1393_v60, %s1079_s18 }
  0x56   : > { %438 = vrot.lane.b32.xlu0 %v1435_v2, %s1079_s18 }
  0x57   : > { %441 = vrot.lane.b32.xlu1 %v1441_v13, %s1079_s18 }
  0x5a   : > { %444 = vrot.lane.b32.xlu0 %v1447_v15, %s1079_s18 }
  0x5b   : > { %447 = vrot.lane.b32.xlu1 %v1453_v17, %s1079_s18 }
  0xb0   : > { %v227_v19 = vpop.permute.xlu0 %226  ;;  %v233_v20 = vpop.permute.xlu1 %232 }
  0xb1   : > { %v228_v21 = vsel %vm225_vm4, %v227_v19, %v1224_v3  ;;  %v234_v28 = vsel %vm225_vm4, %v233_v20, %v1227_v4 }
  0xb2   : > { %250 = vrot.lane.b32.xlu0 %v228_v21, %s1079_s18 }
  0xb4   : > { %v230_v32 = vpop.permute.xlu0 %229 }
  0xb5   : > { %v236_v35 = vpop.permute.xlu1 %235  ;;  %v231_v39 = vsel %vm225_vm4, %v230_v32, %v1230_v5 }
  0xb6   : > { %254 = vrot.lane.b32.xlu0 %v234_v28, %s1079_s18  ;;  %252 = vrot.lane.b32.xlu1 %v231_v39, %s1079_s18  ;;  %v237_v41 = vsel %vm225_vm4, %v236_v35, %v1240_v6 }
  0xb8   : > { %v239_v42 = vpop.permute.xlu0 %238 }
  0xb9   : > { %v242_v43 = vpop.permute.xlu1 %241  ;;  %v240_v46 = vsel %vm225_vm4, %v239_v42, %v1250_v14 }
  0xba   : > { %258 = vrot.lane.b32.xlu0 %v240_v46, %s1079_s18  ;;  %256 = vrot.lane.b32.xlu1 %v237_v41, %s1079_s18  ;;  %v243_v47 = vsel %vm225_vm4, %v242_v43, %v1274_v22 }
  0xbc   : > { %v245_v54 = vpop.permute.xlu0 %244 }
  0xbd   : > { %v248_v61 = vpop.permute.xlu1 %247  ;;  %v246_v62 = vsel %vm225_vm4, %v245_v54, %v1319_v36 }
  0xbe   : > { %262 = vrot.lane.b32.xlu0 %v246_v62, %s1079_s18  ;;  %260 = vrot.lane.b32.xlu1 %v243_v47, %s1079_s18  ;;  %v249_v19 = vsel %vm225_vm4, %v248_v61, %v1322_v37 }
  0xc0   : > { %v427_v20 = vpop.permute.xlu0 %426 }
  0xc1   : > { %v430_v21 = vpop.permute.xlu1 %429  ;;  %v428_v28 = vsel %vm225_vm4, %v427_v20, %v1349_v48 }
  0xc2   : > { %264 = vrot.lane.b32.xlu1 %v249_v19, %s1079_s18  ;;  %450 = vrot.lane.b32.xlu0 %v428_v28, %s1079_s18  ;;  %v431_v32 = vsel %vm225_vm4, %v430_v21, %v1367_v52 }
  0xc4   : > { %v433_v35 = vpop.permute.xlu0 %432 }
  0xc5   : > { %v436_v39 = vpop.permute.xlu1 %435  ;;  %v434_v41 = vsel %vm225_vm4, %v433_v35, %v1389_v59 }
  0xc6   : > { %454 = vrot.lane.b32.xlu0 %v434_v41, %s1079_s18  ;;  %452 = vrot.lane.b32.xlu1 %v431_v32, %s1079_s18  ;;  %v437_v42 = vsel %vm225_vm4, %v436_v39, %v1393_v60 }
  0xc8   : > { %v439_v43 = vpop.permute.xlu0 %438 }
  0xc9   : > { %v442_v46 = vpop.permute.xlu1 %441  ;;  %v440_v47 = vsel %vm225_vm4, %v439_v43, %v1435_v2 }
  0xca   : > { %458 = vrot.lane.b32.xlu0 %v440_v47, %s1079_s18  ;;  %456 = vrot.lane.b32.xlu1 %v437_v42, %s1079_s18  ;;  %v443_v54 = vsel %vm225_vm4, %v442_v46, %v1441_v13 }
  0xcc   : > { %v445_v61 = vpop.permute.xlu0 %444 }
  0xcd   : > { %v448_v62 = vpop.permute.xlu1 %447  ;;  %v446_v19 = vsel %vm225_vm4, %v445_v61, %v1447_v15 }
  0xce   : > { %462 = vrot.lane.b32.xlu0 %v446_v19, %s1079_s18  ;;  %460 = vrot.lane.b32.xlu1 %v443_v54, %s1079_s18  ;;  %v449_v20 = vsel %vm225_vm4, %v448_v62, %v1453_v17 }
  0xd2   : > { %464 = vrot.lane.b32.xlu1 %v449_v20, %s1079_s18 }
 0x124   : > { %v251_v21 = vpop.permute.xlu0 %250 }
 0x125   : > { %v266_v28 = vsel %vm225_vm4, %v251_v21, %v1224_v3 }
 0x126   : > { %282 = vrot.lane.b32.xlu0 %v266_v28, %s1080_s27 }
 0x128   : > { %v255_v32 = vpop.permute.xlu0 %254  ;;  %v253_v35 = vpop.permute.xlu1 %252 }
 0x129   : > { %v268_v39 = vsel %vm225_vm4, %v255_v32, %v1227_v4  ;;  %v267_v41 = vsel %vm225_vm4, %v253_v35, %v1230_v5 }
 0x12a   : > { %286 = vrot.lane.b32.xlu0 %v268_v39, %s1080_s27  ;;  %284 = vrot.lane.b32.xlu1 %v267_v41, %s1080_s27 }
 0x12c   : > { %v259_v42 = vpop.permute.xlu0 %258  ;;  %v257_v43 = vpop.permute.xlu1 %256 }
 0x12d   : > { %v270_v46 = vsel %vm225_vm4, %v259_v42, %v1250_v14  ;;  %v269_v47 = vsel %vm225_vm4, %v257_v43, %v1240_v6 }
 0x12e   : > { %290 = vrot.lane.b32.xlu0 %v270_v46, %s1080_s27  ;;  %288 = vrot.lane.b32.xlu1 %v269_v47, %s1080_s27 }
 0x130   : > { %v263_v54 = vpop.permute.xlu0 %262  ;;  %v261_v61 = vpop.permute.xlu1 %260 }
 0x131   : > { %v272_v62 = vsel %vm225_vm4, %v263_v54, %v1319_v36  ;;  %v271_v19 = vsel %vm225_vm4, %v261_v61, %v1274_v22 }
 0x132   : > { %294 = vrot.lane.b32.xlu0 %v272_v62, %s1080_s27  ;;  %292 = vrot.lane.b32.xlu1 %v271_v19, %s1080_s27 }
 0x134   : > { %v265_v20 = vpop.permute.xlu1 %264  ;;  %v451_v32 = vpop.permute.xlu0 %450 }
 0x135   : > { %v273_v21 = vsel %vm225_vm4, %v265_v20, %v1322_v37  ;;  %v1572_v20 = vand.u32 127, %v164_v0 }
 0x136   : > { %314 = vrot.lane.b32.xlu0 %v266_v28, %s1081_s29  ;;  %296 = vrot.lane.b32.xlu1 %v273_v21, %s1080_s27  ;;  %v466_v28 = vsel %vm225_vm4, %v451_v32, %v1349_v48 }
 0x137   : > { %vm173_vm5 = vcmp.eq.s32.totalorder %v1572_v20, 0  ;;  %vm174_vm6 = vcmp.eq.s32.totalorder %v1572_v20, 15 }
 0x138   : > { %v453_v35 = vpop.permute.xlu1 %452  ;;  %v455_v42 = vpop.permute.xlu0 %454 }
 0x13a   : > { %318 = vrot.lane.b32.xlu0 %v268_v39, %s1081_s29  ;;  %316 = vrot.lane.b32.xlu1 %v267_v41, %s1081_s29  ;;  %v468_v41 = vsel %vm225_vm4, %v455_v42, %v1389_v59 }
 0x13c   : > { %v457_v43 = vpop.permute.xlu1 %456  ;;  %v459_v39 = vpop.permute.xlu0 %458 }
 0x13d   : > { %v470_v48 = vsel %vm225_vm4, %v459_v39, %v1435_v2  ;;  %v469_v54 = vsel %vm225_vm4, %v457_v43, %v1393_v60  ;;  %v356_v43 = vmul.f32 2.0, %v1227_v4  ;;  %v355_v4 = vmul.f32 2.0, %v1230_v5 }
 0x13e   : > { %322 = vrot.lane.b32.xlu0 %v270_v46, %s1081_s29  ;;  %320 = vrot.lane.b32.xlu1 %v269_v47, %s1081_s29  ;;  %v467_v46 = vsel %vm225_vm4, %v453_v35, %v1367_v52  ;;  %v354_v35 = vmul.f32 2.0, %v1224_v3 }
 0x140   : > { %v461_v47 = vpop.permute.xlu1 %460  ;;  %v463_v61 = vpop.permute.xlu0 %462 }
 0x141   : > { %v472_v59 = vsel %vm225_vm4, %v463_v61, %v1447_v15  ;;  %v471_v52 = vsel %vm225_vm4, %v461_v47, %v1441_v13 }
 0x142   : > { %326 = vrot.lane.b32.xlu0 %v272_v62, %s1081_s29  ;;  %324 = vrot.lane.b32.xlu1 %v271_v19, %s1081_s29 }
 0x144   : > { %v465_v62 = vpop.permute.xlu1 %464 }
 0x145   : > { %v473_v2 = vsel %vm225_vm4, %v465_v62, %v1453_v17 }
 0x146   : > { %482 = vrot.lane.b32.xlu0 %v466_v28, %s1080_s27  ;;  %328 = vrot.lane.b32.xlu1 %v273_v21, %s1081_s29 }
 0x14a   : > { %486 = vrot.lane.b32.xlu0 %v468_v41, %s1080_s27  ;;  %484 = vrot.lane.b32.xlu1 %v467_v46, %s1080_s27 }
 0x14e   : > { %490 = vrot.lane.b32.xlu0 %v470_v48, %s1080_s27  ;;  %488 = vrot.lane.b32.xlu1 %v469_v54, %s1080_s27 }
 0x152   : > { %494 = vrot.lane.b32.xlu0 %v472_v59, %s1080_s27  ;;  %492 = vrot.lane.b32.xlu1 %v471_v52, %s1080_s27 }
 0x156   : > { %514 = vrot.lane.b32.xlu0 %v466_v28, %s1081_s29  ;;  %496 = vrot.lane.b32.xlu1 %v473_v2, %s1080_s27 }
 0x15a   : > { %518 = vrot.lane.b32.xlu0 %v468_v41, %s1081_s29  ;;  %516 = vrot.lane.b32.xlu1 %v467_v46, %s1081_s29  ;;  %v1591_v46 = vsub.f32 %v1278_v23, %v354_v35 }
 0x15e   : > { %522 = vrot.lane.b32.xlu0 %v470_v48, %s1081_s29  ;;  %520 = vrot.lane.b32.xlu1 %v469_v54, %s1081_s29  ;;  %v1599_v48 = vsub.f32 %v1297_v29, %v356_v43 }
 0x162   : > { %526 = vrot.lane.b32.xlu0 %v472_v59, %s1081_s29  ;;  %524 = vrot.lane.b32.xlu1 %v471_v52, %s1081_s29  ;;  %v358_v59 = vmul.f32 2.0, %v1250_v14 }
 0x166   : > { %528 = vrot.lane.b32.xlu1 %v473_v2, %s1081_s29  ;;  %v1625_v2 = vsub.f32 %v1308_v33, %v355_v4 }
 0x198   : > { %v283_v60 = vpop.permute.xlu0 %282 }
 0x199   : > { %v1580_v39 = vsel %vm173_vm5, 0.0, %v283_v60 }
 0x19c   : > { %v287_v13 = vpop.permute.xlu0 %286  ;;  %v285_v15 = vpop.permute.xlu1 %284 }
 0x19d   : > { %v1604_v52 = vsel %vm173_vm5, 0.0, %v287_v13  ;;  %v1608_v23 = vsel %vm173_vm5, 0.0, %v285_v15  ;;  %v357_v13 = vmul.f32 2.0, %v1240_v6 }
 0x1a0   : > { %v291_v17 = vpop.permute.xlu0 %290  ;;  %v289_v19 = vpop.permute.xlu1 %288 }
 0x1a1   : > { %v1640_v33 = vsel %vm173_vm5, 0.0, %v291_v17 }
 0x1a4   : > { %v295_v21 = vpop.permute.xlu0 %294  ;;  %v293_v32 = vpop.permute.xlu1 %292 }
 0x1a8   : > { %v315_v42 = vpop.permute.xlu0 %314  ;;  %v297_v28 = vpop.permute.xlu1 %296 }
 0x1a9   : > { %v1584_v0 = vsel %vm174_vm6, 0.0, %v315_v42  ;;  %v1588_v41 = vsel %vm173_vm5, 0.0, %v297_v28  ;;  %v1635_v42 = vsub.f32 %v1353_v49, %v358_v59  ;;  %v1653_v49 = vsel %vm173_vm5, 0.0, %v289_v19 }
 0x1aa   : > { %2055 = vst [vmem:[#allocation10_spill] sm:$0xff] %v1588_v41  ;;  %v370_v3 = vadd.f32 %v1584_v0, %v1580_v39  ;;  %v1672_v19 = vsel %vm173_vm5, 0.0, %v295_v21 }
 0x1ac   : > { %v1596_v47 = vsub.f32 %v370_v3, %v354_v35  ;;  %v319_v54 = vpop.permute.xlu0 %318  ;;  %v317_v61 = vpop.permute.xlu1 %316 }
 0x1ad   : > { %v1612_v5 = vsel %vm174_vm6, 0.0, %v319_v54  ;;  %v1616_v29 = vsel %vm174_vm6, 0.0, %v317_v61  ;;  %v360_v54 = vmul.f32 2.0, %v1319_v36 }
 0x1ae   : > { %v1620_v62 = vmul.f32 %v1596_v47, %v1591_v46  ;;  %v372_v14 = vadd.f32 %v1612_v5, %v1604_v52  ;;  %v371_v60 = vadd.f32 %v1616_v29, %v1608_v23 }
 0x1b0   : > { %v1630_v15 = vsub.f32 %v372_v14, %v356_v43  ;;  %v1632_v35 = vsub.f32 %v371_v60, %v355_v4  ;;  %v323_v28 = vpop.permute.xlu0 %322  ;;  %v321_v3 = vpop.permute.xlu1 %320  ;;  %v359_v43 = vmul.f32 2.0, %v1274_v22  ;;  %v1666_v14 = vsub.f32 %v1359_v51, %v357_v13 }
 0x1b1   : > { %v1644_v61 = vsel %vm174_vm6, 0.0, %v323_v28  ;;  %v1648_v6 = vsel %vm174_vm6, 0.0, %v321_v3  ;;  %v1677_v28 = vsub.f32 %v1383_v57, %v360_v54  ;;  %v1682_v51 = vsel %vm173_vm5, 0.0, %v293_v32 }
 0x1b2   : > { %v1657_v36 = vmul.f32 %v1630_v15, %v1599_v48  ;;  %v1661_v17 = vmul.f32 %v1632_v35, %v1625_v2  ;;  %v374_v4 = vadd.f32 %v1644_v61, %v1640_v33  ;;  %v373_v22 = vadd.f32 %v1648_v6, %v1653_v49 }
 0x1b3   : > { %2056 = vst [vmem:[#allocation11_spill] sm:$0xff] %v1677_v28  ;;  %v1701_v32 = vsub.f32 %v1421_v10, %v359_v43 }
 0x1b4   : > { %v1674_v60 = vsub.f32 %v374_v4, %v358_v59  ;;  %v327_v3 = vpop.permute.xlu0 %326  ;;  %v325_v1 = vpop.permute.xlu1 %324  ;;  %v1684_v58 = vsub.f32 %v373_v22, %v357_v13 }
 0x1b5   : > { %v1688_v53 = vsel %vm174_vm6, 0.0, %v327_v3  ;;  %v1692_v21 = vsel %vm174_vm6, 0.0, %v325_v1  ;;  %2057 = vst [vmem:[#allocation12_spill] sm:$0xff] %v1701_v32 }
 0x1b6   : > { %v1696_v57 = vmul.f32 %v1674_v60, %v1635_v42  ;;  %v376_v37 = vadd.f32 %v1688_v53, %v1672_v19  ;;  %v375_v59 = vadd.f32 %v1692_v21, %v1682_v51  ;;  %v1707_v13 = vmul.f32 %v1684_v58, %v1666_v14 }
 0x1b8   : > { %v1709_v4 = vsub.f32 %v376_v37, %v360_v54  ;;  %v1711_v1 = vsub.f32 %v375_v59, %v359_v43  ;;  %v483_v22 = vpop.permute.xlu0 %482  ;;  %v329_v3 = vpop.permute.xlu1 %328  ;;  %v2064_v43 = vsub.f32 %v1256_v16, %v1262_v18 }
 0x1b9   : > { %v1718_v10 = vsel %vm174_vm6, 0.0, %v329_v3 }
 0x1ba   : > { %2058 = vst [vmem:[#allocation13_spill] sm:$0xff] %v1709_v4  ;;  %2059 = vst [vmem:[#allocation14_spill] sm:$0xff] %v1711_v1  ;;  %v1722_v34 = vmul.f32 %v1709_v4, %v1677_v28  ;;  %v1726_v30 = vmul.f32 %v1711_v1, %v1701_v32  ;;  %v377_v54 = vadd.f32 %v1718_v10, %v1588_v41  ;;  %v506_v4 = vsel %vm173_vm5, 0.0, %v483_v22 }
 0x1bb   : > { %2061 = vst [vmem:[#allocation16_spill] sm:$0xff] %v1718_v10  ;;  %v1747_v41 = vmul.f32 0.5, %v2064_v43  ;;  %v2066_v22 = vsub.f32 %v1303_v31, %v1292_v27  ;;  %v2067_v31 = vsub.f32 %v1339_v44, %v1326_v38  ;;  %v2070_v38 = vsub.f32 %v1409_v7, %v1405_v63 }
 0x1bc   : > { %v1732_v12 = vsub.f32 %v377_v54, %v361_v11  ;;  %v487_v37 = vpop.permute.xlu0 %486  ;;  %v485_v59 = vpop.permute.xlu1 %484 }
 0x1bd   : > { %v1793_v44 = vmul.f32 0.5, %v2070_v38 }
 0x1be   : > { %2062 = vst [vmem:[#allocation17_spill] sm:$0xff] %v1732_v12  ;;  %v1736_v3 = vmul.f32 %v1732_v12, %v1714_v50  ;;  %v402_v50 = vsub.f32 %v1584_v0, %v1580_v39  ;;  %v2065_v12 = vsub.f32 %v1288_v26, %v1284_v25  ;;  %v508_v39 = vsel %vm173_vm5, 0.0, %v487_v37 }
 0x1bf   : > { %v507_v25 = vsel %vm173_vm5, 0.0, %v485_v59  ;;  %v1776_v0 = vmul.f32 0.5, %v2067_v31  ;;  %v2069_v59 = vsub.f32 %v1379_v56, %v1375_v55 }
 0x1c0   : > { %2063 = vst [vmem:[#allocation18_spill] sm:$0xff] %v1736_v3  ;;  %v491_v24 = vpop.permute.xlu0 %490  ;;  %v489_v8 = vpop.permute.xlu1 %488  ;;  %v1754_v10 = vmul.f32 0.5, %v2065_v12  ;;  %v1759_v3 = vmul.f32 0.5, %v2066_v22  ;;  %v2068_v12 = vsub.f32 %v1343_v45, %v1331_v40  ;;  %v403_v22 = vsub.f32 %v1616_v29, %v1608_v23 }
 0x1c1   : > { %v510_v63 = vsel %vm173_vm5, 0.0, %v491_v24  ;;  %v509_v23 = vsel %vm173_vm5, 0.0, %v489_v8  ;;  %v405_v24 = vsub.f32 %v1648_v6, %v1653_v49 }
 0x1c2   : > { %v1783_v37 = vmul.f32 0.5, %v2068_v12 }
 0x1c4   : > { %v495_v9 = vpop.permute.xlu0 %494  ;;  %v493_v28 = vpop.permute.xlu1 %492 }
 0x1c5   : > { %v511_v8 = vsel %vm173_vm5, 0.0, %v493_v28 }
 0x1c8   : > { %v515_v32 = vpop.permute.xlu0 %514  ;;  %v1738_v1 = vpop.permute.xlu1 %496 }
 0x1c9   : > { %v538_v11 = vsel %vm174_vm6, 0.0, %v515_v32  ;;  %v404_v32 = vsub.f32 %v1612_v5, %v1604_v52 }
 0x1ca   : > { %v546_v54 = vsub.f32 %v506_v4, %v538_v11  ;;  %v1788_v11 = vmul.f32 0.5, %v2069_v59  ;;  %v1844_v59 = vmul.f32 0.5, %v403_v22  ;;  %v513_v22 = vsel %vm173_vm5, 0.0, %v1738_v1 }
 0x1cb   : > { %v1804_v56 = vmul.f32 0.5, %v404_v32  ;;  %v406_v32 = vsub.f32 %v1644_v61, %v1640_v33 }
 0x1cc   : > { %v1763_v4 = vmul.f32 0.25, %v546_v54  ;;  %v519_v16 = vpop.permute.xlu0 %518  ;;  %v517_v18 = vpop.permute.xlu1 %516  ;;  %v1795_v54 = vmul.f32 0.5, %v402_v50 }
 0x1cd   : > { %v540_v26 = vsel %vm174_vm6, 0.0, %v519_v16  ;;  %v539_v27 = vsel %vm174_vm6, 0.0, %v517_v18  ;;  %v1846_v38 = vmul.f32 0.5, %v406_v32 }
 0x1ce   : > { %v570_v52 = vmul.f32 %v1763_v4, %v1763_v4  ;;  %v548_v5 = vsub.f32 %v508_v39, %v540_v26  ;;  %v547_v43 = vsub.f32 %v507_v25, %v539_v27  ;;  %v512_v26 = vsel %vm173_vm5, 0.0, %v495_v9 }
 0x1cf   : > { %v408_v9 = vsub.f32 %v1688_v53, %v1672_v19 }
 0x1d0   : > { %v578_v16 = vsub.f32 %v1620_v62, %v570_v52  ;;  %v1800_v40 = vmul.f32 0.25, %v548_v5  ;;  %v1802_v45 = vmul.f32 0.25, %v547_v43  ;;  %v523_v18 = vpop.permute.xlu0 %522  ;;  %v521_v55 = vpop.permute.xlu1 %520 }
 0x1d1   : > { %v542_v50 = vsel %vm174_vm6, 0.0, %v523_v18  ;;  %v541_v7 = vsel %vm174_vm6, 0.0, %v521_v55  ;;  %v1852_v18 = vmul.f32 0.5, %v405_v24 }
 0x1d2   : > { %946 = vrcp.f32 %v578_v16  ;;  %v572_v29 = vmul.f32 %v1800_v40, %v1800_v40  ;;  %v571_v62 = vmul.f32 %v1802_v45, %v1802_v45  ;;  %v550_v39 = vsub.f32 %v510_v63, %v542_v50 }
 0x1d3   : > { %v549_v25 = vsub.f32 %v509_v23, %v541_v7  ;;  %v1858_v63 = vmul.f32 0.5, %v408_v9 }
 0x1d4   : > { %v580_v27 = vsub.f32 %v1657_v36, %v572_v29  ;;  %v579_v31 = vsub.f32 %v1661_v17, %v571_v62  ;;  %v527_v52 = vpop.permute.xlu0 %526  ;;  %v525_v5 = vpop.permute.xlu1 %524  ;;  %v1828_v43 = vmul.f32 0.25, %v550_v39  ;;  %v407_v17 = vsub.f32 %v1692_v21, %v1682_v51 }
 0x1d5   : > { %v1830_v33 = vmul.f32 0.25, %v549_v25  ;;  %v544_v61 = vsel %vm174_vm6, 0.0, %v527_v52  ;;  %v543_v6 = vsel %vm174_vm6, 0.0, %v525_v5  ;;  %v612_v62 = vsub.f32 0.0, %v1800_v40 }
 0x1d6   : > { %948 = vrcp.f32 %v580_v27  ;;  %v552_v49 = vsub.f32 %v512_v26, %v544_v61  ;;  %v551_v36 = vsub.f32 %v511_v8, %v543_v6  ;;  %v574_v28 = vmul.f32 %v1828_v43, %v1828_v43 }
 0x1d7   : > { %950 = vrcp.f32 %v579_v31  ;;  %v573_v12 = vmul.f32 %v1830_v33, %v1830_v33  ;;  %v1867_v23 = vmul.f32 0.5, %v407_v17  ;;  %v614_v26 = vsub.f32 0.0, %v1828_v43 }
 0x1d8   : > { %v1848_v16 = vmul.f32 0.25, %v552_v49  ;;  %v1850_v53 = vmul.f32 0.25, %v551_v36  ;;  %v529_v19 = vpop.permute.xlu1 %528  ;;  %v582_v51 = vsub.f32 %v1696_v57, %v574_v28  ;;  %v610_v57 = vsub.f32 0.0, %v1763_v4 }
 0x1d9   : > { %v581_v21 = vsub.f32 %v1707_v13, %v573_v12  ;;  %v545_v55 = vsel %vm174_vm6, 0.0, %v529_v19  ;;  %v611_v4 = vsub.f32 0.0, %v1802_v45  ;;  %v613_v8 = vsub.f32 0.0, %v1830_v33  ;;  %v2072_v33 = vld [vmem:[#allocation11_spill] sm:$0xff] }
 0x1da   : > { %v576_v50 = vmul.f32 %v1848_v16, %v1848_v16  ;;  %v575_v7 = vmul.f32 %v1850_v53, %v1850_v53  ;;  %952 = vrcp.f32 %v582_v51  ;;  %v553_v13 = vsub.f32 %v513_v22, %v545_v55 }
 0x1db   : > { %954 = vrcp.f32 %v581_v21  ;;  %v615_v31 = vsub.f32 0.0, %v1850_v53 }
 0x1dc   : > { %v947_v29 = vpop.eup %946  ;;  %v584_v20 = vsub.f32 %v1722_v34, %v576_v50  ;;  %v583_v1 = vsub.f32 %v1726_v30, %v575_v7  ;;  %v1875_v25 = vmul.f32 0.25, %v553_v13 }
 0x1dd   : > { %v602_v32 = vmul.f32 %v947_v29, %v1596_v47  ;;  %v618_v24 = vmul.f32 %v947_v29, %v610_v57  ;;  %v626_v39 = vmul.f32 %v947_v29, %v1591_v46  ;;  %v616_v46 = vsub.f32 0.0, %v1848_v16 }
 0x1de   : > { %956 = vrcp.f32 %v584_v20  ;;  %v1888_v45 = vmul.f32 %v1875_v25, %v1875_v25 }
 0x1df   : > { %v634_v40 = vmul.f32 %v602_v32, %v1747_v41  ;;  %v642_v34 = vmul.f32 %v618_v24, %v1795_v54  ;;  %v666_v30 = vmul.f32 %v618_v24, %v1747_v41  ;;  %v674_v47 = vmul.f32 %v626_v39, %v1795_v54 }
 0x1e0   : > { %v949_v27 = vpop.eup %948  ;;  %958 = vrcp.f32 %v583_v1 }
 0x1e1   : > { %v951_v52 = vpop.eup %950  ;;  %v650_v5 = vadd.f32 %v642_v34, %v634_v40  ;;  %v682_v43 = vadd.f32 %v674_v47, %v666_v30  ;;  %v604_v61 = vmul.f32 %v949_v27, %v1630_v15  ;;  %v620_v6 = vmul.f32 %v949_v27, %v612_v62 }
 0x1e2   : > { %v628_v41 = vmul.f32 %v949_v27, %v1599_v48  ;;  %v603_v54 = vmul.f32 %v951_v52, %v1632_v35  ;;  %v619_v9 = vmul.f32 %v951_v52, %v611_v4  ;;  %v627_v49 = vmul.f32 %v951_v52, %v1625_v2 }
 0x1e3   : > { %v658_v36 = vsub.f32 0.0, %v650_v5  ;;  %v690_v17 = vsub.f32 0.0, %v682_v43  ;;  %v636_v28 = vmul.f32 %v604_v61, %v1754_v10  ;;  %v644_v12 = vmul.f32 %v620_v6, %v1804_v56  ;;  %v2071_v5 = vld [vmem:[#allocation13_spill] sm:$0xff] }
 0x1e4   : > { %v668_v19 = vmul.f32 %v620_v6, %v1754_v10  ;;  %v676_v51 = vmul.f32 %v628_v41, %v1804_v56  ;;  %v635_v15 = vmul.f32 %v603_v54, %v1759_v3  ;;  %v643_v21 = vmul.f32 %v619_v9, %v1844_v59  ;;  %v953_v48 = vpop.eup %952 }
 0x1e5   : > { %vm698_vm8 = vcmp.ne.f32.partialorder %v658_v36, %v658_v36  ;;  %vm714_vm9 = vcmp.ne.f32.partialorder %v690_v17, %v690_v17  ;;  %v652_v35 = vadd.f32 %v644_v12, %v636_v28  ;;  %v667_v2 = vmul.f32 %v619_v9, %v1759_v3  ;;  %v955_v55 = vpop.eup %954  ;;  %v2073_v12 = vld [vmem:[#allocation14_spill] sm:$0xff] }
 0x1e6   : > { %v706_v22 = vsel %vm698_vm8, 0.0, %v658_v36  ;;  %v722_v50 = vsel %vm714_vm9, 0.0, %v690_v17  ;;  %v684_v7 = vadd.f32 %v676_v51, %v668_v19  ;;  %v651_v57 = vadd.f32 %v643_v21, %v635_v15 }
 0x1e7   : > { %731 = vst.msk [vmem:[%s1902_s2] sm:$0xff] %vm730_vm7, %v706_v22  ;;  %862 = vst.msk [vmem:[%s1902_s2 + $0x40] sm:$0xff] %vm730_vm7, %v722_v50  ;;  %v660_v10 = vsub.f32 0.0, %v652_v35  ;;  %v675_v56 = vmul.f32 %v627_v49, %v1844_v59  ;;  %v606_v13 = vmul.f32 %v953_v48, %v1674_v60  ;;  %v622_v29 = vmul.f32 %v953_v48, %v614_v26 }
 0x1e8   : > { %v957_v3 = vpop.eup %956  ;;  %v692_v62 = vsub.f32 0.0, %v684_v7  ;;  %v659_v20 = vsub.f32 0.0, %v651_v57  ;;  %v630_v1 = vmul.f32 %v953_v48, %v1635_v42  ;;  %v605_v32 = vmul.f32 %v955_v55, %v1684_v58 }
 0x1e9   : > { %vm700_vm10 = vcmp.ne.f32.partialorder %v660_v10, %v660_v10  ;;  %v683_v24 = vadd.f32 %v675_v56, %v667_v2  ;;  %v638_v39 = vmul.f32 %v606_v13, %v1776_v0  ;;  %v646_v4 = vmul.f32 %v622_v29, %v1846_v38  ;;  %v2074_v2 = vld [vmem:[#allocation12_spill] sm:$0xff]  ;;  %v2075_v13 = vld [vmem:[#allocation18_spill] sm:$0xff] }
 0x1ea   : > { %v959_v59 = vpop.eup %958  ;;  %v708_v40 = vsel %vm700_vm10, 0.0, %v660_v10  ;;  %vm716_vm11 = vcmp.ne.f32.partialorder %v692_v62, %v692_v62  ;;  %vm699_vm12 = vcmp.ne.f32.partialorder %v659_v20, %v659_v20  ;;  %v670_v60 = vmul.f32 %v622_v29, %v1776_v0 }
 0x1eb   : > { %v724_v26 = vsel %vm716_vm11, 0.0, %v692_v62  ;;  %733 = vst.msk [vmem:[%s1902_s2 + $0x10] sm:$0xff] %vm730_vm7, %v708_v40  ;;  %v691_v42 = vsub.f32 0.0, %v683_v24  ;;  %v707_v34 = vsel %vm699_vm12, 0.0, %v659_v20  ;;  %v654_v58 = vadd.f32 %v646_v4, %v638_v39  ;;  %v2079_v40 = vld [vmem:[#allocation16_spill] sm:$0xff] }
 0x1ec   : > { %864 = vst.msk [vmem:[%s1902_s2 + $0x50] sm:$0xff] %vm730_vm7, %v724_v26  ;;  %732 = vst.msk [vmem:[%s1902_s2 + $0x8] sm:$0xff] %vm730_vm7, %v707_v34  ;;  %v678_v30 = vmul.f32 %v630_v1, %v1846_v38  ;;  %v621_v47 = vmul.f32 %v955_v55, %v613_v8  ;;  %v629_v27 = vmul.f32 %v955_v55, %v1666_v14  ;;  %v617_v4 = vsub.f32 0.0, %v1875_v25  ;;  %v2082_v34 = vld [vmem:[#allocation17_spill] sm:$0xff] }
 0x1ed   : > { %v637_v0 = vmul.f32 %v605_v32, %v1783_v37  ;;  %vm715_vm13 = vcmp.ne.f32.partialorder %v691_v42, %v691_v42  ;;  %v662_v52 = vsub.f32 0.0, %v654_v58  ;;  %v608_v43 = vmul.f32 %v957_v3, %v2071_v5  ;;  %v2077_v32 = vld [vmem:[#allocation8_spill] sm:$0xff] }
 0x1ee   : > { %v624_v61 = vmul.f32 %v957_v3, %v616_v46  ;;  %v723_v6 = vsel %vm715_vm13, 0.0, %v691_v42  ;;  %v686_v41 = vadd.f32 %v678_v30, %v670_v60  ;;  %v645_v54 = vmul.f32 %v621_v47, %v1852_v18  ;;  %v2080_v60 = vld [vmem:[#allocation10_spill] sm:$0xff] }
 0x1ef   : > { %v669_v38 = vmul.f32 %v621_v47, %v1783_v37  ;;  %863 = vst.msk [vmem:[%s1902_s2 + $0x48] sm:$0xff] %vm730_vm7, %v723_v6  ;;  %vm702_vm14 = vcmp.ne.f32.partialorder %v662_v52, %v662_v52  ;;  %v677_v14 = vmul.f32 %v629_v27, %v1852_v18  ;;  %v632_v8 = vmul.f32 %v957_v3, %v2072_v33  ;;  %v2083_v47 = vld [vmem:[#allocation15_spill] sm:$0xff] }
 0x1f0   : > { %v640_v9 = vmul.f32 %v608_v43, %v1788_v11  ;;  %v694_v49 = vsub.f32 0.0, %v686_v41  ;;  %v710_v36 = vsel %vm702_vm14, 0.0, %v662_v52  ;;  %v653_v16 = vadd.f32 %v645_v54, %v637_v0 }
 0x1f1   : > { %v648_v46 = vmul.f32 %v624_v61, %v1858_v63  ;;  %735 = vst.msk [vmem:[%s1902_s2 + $0x20] sm:$0xff] %vm730_vm7, %v710_v36  ;;  %v685_v17 = vadd.f32 %v677_v14, %v669_v38  ;;  %v672_v37 = vmul.f32 %v624_v61, %v1788_v11  ;;  %v680_v28 = vmul.f32 %v632_v8, %v1858_v63 }
 0x1f2   : > { %v607_v19 = vmul.f32 %v959_v59, %v2073_v12  ;;  %vm718_vm15 = vcmp.ne.f32.partialorder %v694_v49, %v694_v49  ;;  %v661_v18 = vsub.f32 0.0, %v653_v16  ;;  %v623_v15 = vmul.f32 %v959_v59, %v615_v31 }
 0x1f3   : > { %v656_v51 = vadd.f32 %v648_v46, %v640_v9  ;;  %v726_v21 = vsel %vm718_vm15, 0.0, %v694_v49  ;;  %v693_v48 = vsub.f32 0.0, %v685_v17  ;;  %v688_v35 = vadd.f32 %v680_v28, %v672_v37 }
 0x1f4   : > { %v631_v55 = vmul.f32 %v959_v59, %v2074_v2  ;;  %866 = vst.msk [vmem:[%s1902_s2 + $0x60] sm:$0xff] %vm730_vm7, %v726_v21  ;;  %vm701_vm0 = vcmp.ne.f32.partialorder %v661_v18, %v661_v18  ;;  %v639_v63 = vmul.f32 %v607_v19, %v1793_v44  ;;  %v647_v22 = vmul.f32 %v623_v15, %v1867_v23 }
 0x1f5   : > { %v664_v11 = vsub.f32 0.0, %v656_v51  ;;  %v709_v50 = vsel %vm701_vm0, 0.0, %v661_v18  ;;  %vm717_vm1 = vcmp.ne.f32.partialorder %v693_v48, %v693_v48  ;;  %v696_v53 = vsub.f32 0.0, %v688_v35 }
 0x1f6   : > { %v671_v31 = vmul.f32 %v623_v15, %v1793_v44  ;;  %v725_v7 = vsel %vm717_vm1, 0.0, %v693_v48  ;;  %734 = vst.msk [vmem:[%s1902_s2 + $0x18] sm:$0xff] %vm730_vm7, %v709_v50  ;;  %v655_v57 = vadd.f32 %v647_v22, %v639_v63  ;;  %v679_v10 = vmul.f32 %v631_v55, %v1867_v23 }
 0x1f7   : > { %vm704_vm2 = vcmp.ne.f32.partialorder %v664_v11, %v664_v11  ;;  %865 = vst.msk [vmem:[%s1902_s2 + $0x58] sm:$0xff] %vm730_vm7, %v725_v7  ;;  %vm720_vm3 = vcmp.ne.f32.partialorder %v696_v53, %v696_v53  ;;  %v585_v29 = vsub.f32 %v2075_v13, %v1888_v45  ;;  %v2076_v45 = vld [vmem:[#allocation9_spill] sm:$0xff]  ;;  %v2081_v26 = vsub.f32 %v2079_v40, %v2080_v60 }
 0x1f8   : > { %v712_v56 = vsel %vm704_vm2, 0.0, %v664_v11  ;;  %v728_v3 = vsel %vm720_vm3, 0.0, %v696_v53  ;;  %v663_v44 = vsub.f32 0.0, %v655_v57  ;;  %v687_v62 = vadd.f32 %v679_v10, %v671_v31 }
 0x1f9   : > { %737 = vst.msk [vmem:[%s1902_s2 + $0x30] sm:$0xff] %vm730_vm7, %v712_v56  ;;  %868 = vst.msk [vmem:[%s1902_s2 + $0x70] sm:$0xff] %vm730_vm7, %v728_v3  ;;  %960 = vrcp.f32 %v585_v29  ;;  %v2078_v24 = vsub.f32 %v2076_v45, %v2077_v32  ;;  %v417_v42 = vmul.f32 0.5, %v2081_v26 }
 0x1fa   : > { %v695_v20 = vsub.f32 0.0, %v687_v62  ;;  %vm703_vm4 = vcmp.ne.f32.partialorder %v663_v44, %v663_v44 }
 0x1fb   : > { %v711_v1 = vsel %vm703_vm4, 0.0, %v663_v44  ;;  %v401_v39 = vmul.f32 0.5, %v2078_v24 }
 0x1fc   : > { %vm719_vm5 = vcmp.ne.f32.partialorder %v695_v20, %v695_v20  ;;  %736 = vst.msk [vmem:[%s1902_s2 + $0x28] sm:$0xff] %vm730_vm7, %v711_v1 }
 0x1fd   : > { %v727_v23 = vsel %vm719_vm5, 0.0, %v695_v20 }
 0x1fe   : > { %867 = vst.msk [vmem:[%s1902_s2 + $0x68] sm:$0xff] %vm730_vm7, %v727_v23 }
 0x203   : > { %v961_v59 = vpop.eup %960 }
 0x204   : > { %v609_v58 = vmul.f32 %v961_v59, %v2082_v34  ;;  %v625_v30 = vmul.f32 %v961_v59, %v617_v4  ;;  %v633_v27 = vmul.f32 %v961_v59, %v2083_v47 }
 0x206   : > { %v641_v0 = vmul.f32 %v609_v58, %v401_v39  ;;  %v649_v52 = vmul.f32 %v625_v30, %v417_v42  ;;  %v673_v5 = vmul.f32 %v625_v30, %v401_v39  ;;  %v681_v43 = vmul.f32 %v633_v27, %v417_v42 }
 0x208   : > { %v657_v61 = vadd.f32 %v649_v52, %v641_v0  ;;  %v689_v6 = vadd.f32 %v681_v43, %v673_v5 }
 0x20a   : > { %v665_v25 = vsub.f32 0.0, %v657_v61  ;;  %v697_v41 = vsub.f32 0.0, %v689_v6 }
 0x20c   : > { %vm705_vm6 = vcmp.ne.f32.partialorder %v665_v25, %v665_v25  ;;  %vm721_vm8 = vcmp.ne.f32.partialorder %v697_v41, %v697_v41 }
 0x20d   : > { %v713_v54 = vsel %vm705_vm6, 0.0, %v665_v25  ;;  %v729_v38 = vsel %vm721_vm8, 0.0, %v697_v41 }
 0x20e   : > { %738 = vst.msk [vmem:[%s1902_s2 + $0x38] sm:$0xff] %vm730_vm7, %v713_v54  ;;  %869 = vst.msk [vmem:[%s1902_s2 + $0x78] sm:$0xff] %vm730_vm7, %v729_v38 }
 0x20f   : > { %1005 = shalt.err (!%p1002_p5)
}
 0x210   : > { %s1006_s25 = scalar_lea.hbm %s1979_s16, 2048  ;;  %s1010_s4 = scalar_lea.hbm %s2035_s1, 4096 }
 0x211   : > { %p1007_p4 = scmp.ne.s32.totalorder %s1979_s16, %s1006_s25  ;;  %p1011_p12 = scmp.lt.u32.totalorder %s1979_s16, %s2035_s1 }
 0x212   : > { %p1012_p1 = scmp.lt.u32.totalorder %s1010_s4, %s1006_s25  ;;  %p1014_p8 = scmp.lt.u32.totalorder %s1006_s25, %s1979_s16 }
 0x213   : > { %p1008_p7 = pnand %p1007_p4, %p2084_p9 }
 0x214   : > { %p1013_p3 = por %p1012_p1, %p1011_p12 }
 0x215   : > { %p1009_p10 = pneg %p1008_p7 }
 0x216   : > { %p1015_p11 = por %p1014_p8, %p1013_p3 }
 0x218   : > { %p1016_p0 = pnand %p1015_p11, %p1009_p10 }
 0x21a   : > { %1019 = shalt.err (!%p1016_p0)
}
 0x21b   : > { %s1083_s29 = smov 128   ;;  %s1084_s30 = smov 8  }
 0x21c   : > { %879 = dma.vmem_to_hbm [thread:$0]  (%p2084_p9), %s1981_s12, 2048, %s1979_s16, %s749_s9, %s1083_s29, %s1083_s29, %s1084_s30  }
 0x21d PF: > { %s780_s2 = sand.u32 1, %s1054_s6   ;;  %p2085_p6 = scmp.ne.s32.totalorder %s2050_s21, 0 }
 0x21e   : > { %p2086_p13 = scmp.ge.s32.totalorder %s1074_s11, 2  ;;  %s781_s5 = scalar_lea.sflag [#allocation4], %s780_s2 }
 0x220   : > { %p886_p2 = pnand %p2086_p13, %p2085_p6 }
 0x222   : > { %1049 = dma.done.wait (!%p886_p2), %s781_s5, 2048  }
 0x223   : > { %1051 = vsyncadd (!%p886_p2), %s781_s5, 4294965248  ;;  %s17_s11 = sadd.s32 1, %s1074_s11   ;;  %s2087_s6 = smov %s1058_s7 }
 0x224   : > { %p14_p5 = scmp.ge.s32.totalorder %s17_s11, 4   ;;  %s2088_s7 = smov %s1062_s8 }
 0x225   : > { %s2089_s8 = smov %s1151_s20  ;;  %s2090_s9 = smov %s1070_s10 }
 0x226   : > { %s2091_s10 = smov %s2093_s14  ;;  %16 = sbr.rel (!%p14_p5) target bundleno = 6 (0x6), region = 70 }
 0x22d   :  { %786 = vsyncpa [#allocation3], 1 }
 0x22e   :  { %788 = vsyncpa [#allocation3 + $0x1], 1 }
 0x22f   :  { %789 = vsyncpa [#allocation4], 1 }
 0x230   :  { %791 = vsyncpa [#allocation4 + $0x1], 1 }

</bundles_post_ra>
